<compile_context>
chip_gen: v7x
topology: tpu7x:2x2x1
jax: 0.10.0
libtpu: 0.0.40
codegen_flags: <defaults>
</compile_context>

<pallas_src>
import jax
import jax.numpy as jnp
from jax.experimental import pallas as pl
from jax.experimental.pallas import tpu as pltpu


def _lora_qkv_kernel(x_ref, wqkv_ref, bqkv_ref, acat_ref, bcat_ref,
                     out_ref, y_ref):
    """One (tile_m, tile_n) output tile of qkv + fused LoRA delta.

    x_ref    : (tile_m, C)      bf16   row tile (resident across j)
    wqkv_ref : (C, tile_n)      bf16   column tile of W_qkv^T
    bqkv_ref : (1, tile_n)      f32    column tile of bias
    acat_ref : (C, 128)         bf16   [A_q^T | A_v^T | 0]   (grid-invariant)
    bcat_ref : (128, tile_n)    bf16   column tile of [B_q^T | 0 | B_v^T]
    out_ref  : (tile_m, tile_n) out_dtype
    y_ref    : (tile_m, 128)    bf16   VMEM scratch: cached LoRA "A" projection
    """
    x = x_ref[...]

    # Narrow LoRA "A" projection: compute once per row tile, reuse across the
    # whole j sweep (the j axis is marked "arbitrary" so this carry is legal).
    @pl.when(pl.program_id(1) == 0)
    def _():
        y_ref[...] = jnp.dot(
            x, acat_ref[...], preferred_element_type=jnp.float32
        ).astype(y_ref.dtype)

    # Base qkv projection on the MXU (f32 accumulate) + f32 bias.
    qkv = jnp.dot(x, wqkv_ref[...], preferred_element_type=jnp.float32)
    qkv = qkv + bqkv_ref[...]

    # LoRA delta for this column tile: d = y @ [B_q^T | 0 | B_v^T][:, j-tile].
    d = jnp.dot(y_ref[...], bcat_ref[...], preferred_element_type=jnp.float32)

    # Single lane-dense full-width store.
    out_ref[...] = (qkv + d).astype(out_ref.dtype)


def lora_qkv(x, w_qkv, b_qkv, a_q, b_q, a_v, b_v, *,
             tile_m=256, tile_n=768,
             compute_dtype=jnp.bfloat16, out_dtype=jnp.bfloat16):
    """LoRA-augmented qkv projection.

    x: (B, N, C).  Weights stored PyTorch-style:
      w_qkv: (3C, C), b_qkv: (3C,), a_q/a_v: (r, C), b_q/b_v: (C, r).
    Returns (B, N, 3C) in `out_dtype` (x.dtype if out_dtype is None).
    """
    B, N, C = x.shape
    M = B * N
    N3 = 3 * C
    r = a_q.shape[0]
    out_dtype = x.dtype if out_dtype is None else out_dtype

    # --- tile sizes -------------------------------------------------------
    m_pad = 8 * pl.cdiv(M, 8)
    tile_m = min(int(tile_m), m_pad)
    if tile_m >= 128:
        tile_m = 128 * (tile_m // 128)      # 128-aligned M tiles (v5e MXU)
    else:
        tile_m = 8 * pl.cdiv(tile_m, 8)     # sublane-aligned fallback

    if N3 % 128 == 0:
        tile_n = min(int(tile_n), N3)
        tile_n = 128 * max(1, tile_n // 128)
    else:
        tile_n = N3                         # small/odd C: single full-width tile

    grid = (pl.cdiv(M, tile_m), pl.cdiv(N3, tile_n))

    # Fused LoRA rank dimension, zero-padded to full 128 lanes.
    r_pad = 128 * pl.cdiv(2 * r, 128)

    # --- operand prep (plain JAX glue) ------------------------------------
    x2 = x.reshape(M, C).astype(compute_dtype)
    wqkv_t = w_qkv.T.astype(compute_dtype)                      # (C, 3C)
    bias2 = b_qkv.reshape(1, N3).astype(jnp.float32)            # (1, 3C) f32

    # [A_q^T | A_v^T | 0]  : (C, r_pad)
    a_cat = jnp.zeros((C, r_pad), dtype=compute_dtype)
    a_cat = a_cat.at[:, :r].set(a_q.T.astype(compute_dtype))
    a_cat = a_cat.at[:, r:2 * r].set(a_v.T.astype(compute_dtype))

    # [B_q^T | 0 | B_v^T]  : (r_pad, 3C) — zero middle third => single store.
    b_cat = jnp.zeros((r_pad, N3), dtype=compute_dtype)
    b_cat = b_cat.at[:r, :C].set(b_q.T.astype(compute_dtype))
    b_cat = b_cat.at[r:2 * r, 2 * C:].set(b_v.T.astype(compute_dtype))

    # --- scheduler hints ---------------------------------------------------
    itm = jnp.dtype(compute_dtype).itemsize
    flops = (2 * M * C * N3            # base qkv matmul
             + 2 * M * C * r_pad       # LoRA A (once per row tile)
             + 2 * M * r_pad * N3)     # LoRA B
    bytes_accessed = ((M * C + C * N3 + C * r_pad + r_pad * N3) * itm
                      + N3 * 4
                      + M * N3 * jnp.dtype(out_dtype).itemsize)
    cost = pl.CostEstimate(flops=int(flops), transcendentals=0,
                           bytes_accessed=int(bytes_accessed))

    out = pl.pallas_call(
        _lora_qkv_kernel,
        out_shape=jax.ShapeDtypeStruct((M, N3), out_dtype),
        grid_spec=pltpu.PrefetchScalarGridSpec(
            num_scalar_prefetch=0,
            grid=grid,
            in_specs=[
                pl.BlockSpec((tile_m, C), lambda i, j: (i, 0)),       # x rows
                pl.BlockSpec((C, tile_n), lambda i, j: (0, j)),       # W_qkv^T cols
                pl.BlockSpec((1, tile_n), lambda i, j: (0, j)),       # bias cols
                pl.BlockSpec((C, r_pad), lambda i, j: (0, 0)),        # A_cat (const)
                pl.BlockSpec((r_pad, tile_n), lambda i, j: (0, j)),   # B_cat cols
            ],
            out_specs=pl.BlockSpec((tile_m, tile_n), lambda i, j: (i, j)),
            scratch_shapes=[pltpu.VMEM((tile_m, r_pad), compute_dtype)],
        ),
        compiler_params=pltpu.CompilerParams(
            # rows parallel (megacore-shardable); column axis carries the
            # per-row-tile LoRA cache, so it must stay sequential.
            dimension_semantics=("parallel", "arbitrary"),
            vmem_limit_bytes=48 * 1024 * 1024),
        cost_estimate=cost,
    )(x2, wqkv_t, bias2, a_cat, b_cat)

    return out.reshape(B, N, N3)


def lora_qkv_ref(x, w_qkv, b_qkv, a_q, b_q, a_v, b_v):
    """Pure-JAX f32 reference mirroring the PyTorch forward."""
    qkv = jnp.einsum('bnc,oc->bno', x, w_qkv) + b_qkv
    new_q = jnp.einsum('bnr,cr->bnc', jnp.einsum('bnc,rc->bnr', x, a_q), b_q)
    new_v = jnp.einsum('bnr,cr->bnc', jnp.einsum('bnc,rc->bnr', x, a_v), b_v)
    C = x.shape[-1]
    qkv = qkv.at[:, :, :C].add(new_q)
    qkv = qkv.at[:, :, -C:].add(new_v)
    return qkv


if __name__ == "__main__":
    B, N, C, r = 2, 8, 128, 4
    key = jax.random.PRNGKey(0)
    kx, kw, kb, k1, k2, k3, k4 = jax.random.split(key, 7)

    x = jax.random.normal(kx, (B, N, C), dtype=jnp.float32)
    # nn.Linear(dim, 3*dim, bias=True)  -> weight (3C, C), bias (3C,)
    w_qkv = jax.random.normal(kw, (3 * C, C), dtype=jnp.float32) * 0.05
    b_qkv = jax.random.normal(kb, (3 * C,), dtype=jnp.float32) * 0.05
    # LoRA: linear_a_*: Linear(dim, r, bias=False) -> (r, C)
    #       linear_b_*: Linear(r, dim, bias=False) -> (C, r)
    a_q = jax.random.normal(k1, (r, C), dtype=jnp.float32) * 0.05
    b_q = jax.random.normal(k2, (C, r), dtype=jnp.float32) * 0.05
    a_v = jax.random.normal(k3, (r, C), dtype=jnp.float32) * 0.05
    b_v = jax.random.normal(k4, (C, r), dtype=jnp.float32) * 0.05

    # Small tiles so the demo exercises a multi-step grid along BOTH axes
    # (2 row tiles x 3 column tiles), including the cached-LoRA j sweep.
    out = lora_qkv(x, w_qkv, b_qkv, a_q, b_q, a_v, b_v, tile_m=8, tile_n=128)
    out = jax.block_until_ready(out)

    ref = lora_qkv_ref(x, w_qkv, b_qkv, a_q, b_q, a_v, b_v)
    assert out.shape == (B, N, 3 * C)
    # bf16 MXU matmuls with f32 accumulation + bf16 output vs f32 reference.
    assert jnp.allclose(out.astype(jnp.float32), ref, atol=2e-2, rtol=2e-2), \
        "mismatch vs reference"

    print("KERNEL_OK")
</pallas_src>

<mosaic_0001>
module attributes {stable_mosaic.version = 11 : i64} {
  func.func @_lora_qkv_kernel(%arg0: i32, %arg1: i32, %arg2: memref<8x128xbf16, #tpu.memory_space<vmem>>, %arg3: memref<128x128xbf16, #tpu.memory_space<vmem>>, %arg4: memref<1x128xf32, #tpu.memory_space<vmem>>, %arg5: memref<128x128xbf16, #tpu.memory_space<vmem>>, %arg6: memref<128x128xbf16, #tpu.memory_space<vmem>>, %arg7: memref<8x128xbf16, #tpu.memory_space<vmem>>, %arg8: memref<8x128xbf16, #tpu.memory_space<vmem>>) attributes {dimension_semantics = [#tpu.dimension_semantics<parallel>, #tpu.dimension_semantics<arbitrary>], iteration_bounds = array<i64: 2, 3>, scalar_prefetch = 0 : i64, scratch_operands = 1 : i64, tpu.core_type = #tpu.core_type<tc>, window_params = [{transform_indices = @transform_0, window_bounds = array<i64: 8, 128>}, {transform_indices = @transform_1, window_bounds = array<i64: 128, 128>}, {transform_indices = @transform_2, window_bounds = array<i64: 1, 128>}, {pipeline_mode = #tpu.pipeline_mode<synchronous>, transform_indices = @transform_3, window_bounds = array<i64: 128, 128>}, {transform_indices = @transform_4, window_bounds = array<i64: 128, 128>}, {transform_indices = @transform_5, window_bounds = array<i64: 8, 128>}]} {
    %c0 = arith.constant 0 : index
    %c0_0 = arith.constant 0 : index
    %0 = vector.load %arg2[%c0, %c0_0] : memref<8x128xbf16, #tpu.memory_space<vmem>>, vector<8x128xbf16>
    %c0_i32 = arith.constant 0 : i32
    %1 = arith.cmpi eq, %arg1, %c0_i32 : i32
    %2 = arith.extui %1 : i1 to i32
    %c0_i32_1 = arith.constant 0 : i32
    %3 = arith.cmpi ne, %2, %c0_i32_1 : i32
    scf.if %3 {
      %c0_13 = arith.constant 0 : index
      %c0_14 = arith.constant 0 : index
      %15 = vector.load %arg5[%c0_13, %c0_14] : memref<128x128xbf16, #tpu.memory_space<vmem>>, vector<128x128xbf16>
      %cst_15 = arith.constant dense<0.000000e+00> : vector<8x128xf32>
      %16 = tpu.matmul %0, %15, %cst_15 {dimension_numbers = #tpu.dot_dimension_numbers<[1], [0], [0], [1], [0, 0, 1, 1], [], []>} : vector<8x128xbf16>, vector<128x128xbf16>, vector<8x128xf32> -> vector<8x128xf32>
      %17 = arith.truncf %16 : vector<8x128xf32> to vector<8x128xbf16>
      %c0_16 = arith.constant 0 : index
      %c0_17 = arith.constant 0 : index
      %18 = vector.load %arg8[%c0_16, %c0_17] : memref<8x128xbf16, #tpu.memory_space<vmem>>, vector<8x128xbf16>
      tpu.vector_store %arg8[%c0_16, %c0_17], %17 {strides = array<i32>} : memref<8x128xbf16, #tpu.memory_space<vmem>>, vector<8x128xbf16>,
    } else {
    }
    %c0_2 = arith.constant 0 : index
    %c0_3 = arith.constant 0 : index
    %4 = vector.load %arg3[%c0_2, %c0_3] : memref<128x128xbf16, #tpu.memory_space<vmem>>, vector<128x128xbf16>
    %cst = arith.constant dense<0.000000e+00> : vector<8x128xf32>
    %5 = tpu.matmul %0, %4, %cst {dimension_numbers = #tpu.dot_dimension_numbers<[1], [0], [0], [1], [0, 0, 1, 1], [], []>} : vector<8x128xbf16>, vector<128x128xbf16>, vector<8x128xf32> -> vector<8x128xf32>
    %c0_4 = arith.constant 0 : index
    %c0_5 = arith.constant 0 : index
    %6 = vector.load %arg4[%c0_4, %c0_5] : memref<1x128xf32, #tpu.memory_space<vmem>>, vector<1x128xf32>
    %7 = vector.broadcast %6 : vector<1x128xf32> to vector<8x128xf32>
    %8 = arith.addf %5, %7 : vector<8x128xf32>
    %c0_6 = arith.constant 0 : index
    %c0_7 = arith.constant 0 : index
    %9 = vector.load %arg8[%c0_6, %c0_7] : memref<8x128xbf16, #tpu.memory_space<vmem>>, vector<8x128xbf16>
    %c0_8 = arith.constant 0 : index
    %c0_9 = arith.constant 0 : index
    %10 = vector.load %arg6[%c0_8, %c0_9] : memref<128x128xbf16, #tpu.memory_space<vmem>>, vector<128x128xbf16>
    %cst_10 = arith.constant dense<0.000000e+00> : vector<8x128xf32>
    %11 = tpu.matmul %9, %10, %cst_10 {dimension_numbers = #tpu.dot_dimension_numbers<[1], [0], [0], [1], [0, 0, 1, 1], [], []>} : vector<8x128xbf16>, vector<128x128xbf16>, vector<8x128xf32> -> vector<8x128xf32>
    %12 = arith.addf %8, %11 : vector<8x128xf32>
    %13 = arith.truncf %12 : vector<8x128xf32> to vector<8x128xbf16>
    %c0_11 = arith.constant 0 : index
    %c0_12 = arith.constant 0 : index
    %14 = vector.load %arg7[%c0_11, %c0_12] : memref<8x128xbf16, #tpu.memory_space<vmem>>, vector<8x128xbf16>
    tpu.vector_store %arg7[%c0_11, %c0_12], %13 {strides = array<i32>} : memref<8x128xbf16, #tpu.memory_space<vmem>>, vector<8x128xbf16>,
    return
  }
  func.func @transform_0(%arg0: i32, %arg1: i32) -> (i32, i32) {
    %c0_i32 = arith.constant 0 : i32
    %c0_i32_0 = arith.constant 0 : i32
    return %arg0, %c0_i32 : i32, i32
  }
  func.func @transform_1(%arg0: i32, %arg1: i32) -> (i32, i32) {
    %c0_i32 = arith.constant 0 : i32
    %c0_i32_0 = arith.constant 0 : i32
    return %c0_i32, %arg1 : i32, i32
  }
  func.func @transform_2(%arg0: i32, %arg1: i32) -> (i32, i32) {
    %c0_i32 = arith.constant 0 : i32
    %c0_i32_0 = arith.constant 0 : i32
    return %c0_i32, %arg1 : i32, i32
  }
  func.func @transform_3(%arg0: i32, %arg1: i32) -> (i32, i32) {
    %c0_i32 = arith.constant 0 : i32
    %c0_i32_0 = arith.constant 0 : i32
    %c0_i32_1 = arith.constant 0 : i32
    return %c0_i32, %c0_i32_0 : i32, i32
  }
  func.func @transform_4(%arg0: i32, %arg1: i32) -> (i32, i32) {
    %c0_i32 = arith.constant 0 : i32
    %c0_i32_0 = arith.constant 0 : i32
    return %c0_i32, %arg1 : i32, i32
  }
  func.func @transform_5(%arg0: i32, %arg1: i32) -> (i32, i32) {
    %c0_i32 = arith.constant 0 : i32
    return %arg0, %arg1 : i32, i32
  }
}

</mosaic_0001>

<bundles_post_ra>
// kernel: tpu_custom_call.1
= control target key start
LH: loop header
LB: loop body
LE: loop exit
PB: predicated region body
PF: predicated region fallthrough
CT: control target
= control target key end

     0   :  { %s1954_s0 = inlined_call_operand.hbm [shape: bf16[16,128], index: 0, kind: input, shape index: {}]   ;;  %s1955_s1 = inlined_call_operand.hbm [shape: bf16[128,384], index: 1, kind: input, shape index: {}]   ;;  %s1956_s2 = inlined_call_operand.vmem [shape: f32[1,384], index: 2, kind: input, shape index: {}]   ;;  %s1957_s3 = inlined_call_operand.hbm [shape: bf16[128,128], index: 3, kind: input, shape index: {}]   ;;  %s1958_s4 = inlined_call_operand.hbm [shape: bf16[128,384], index: 4, kind: input, shape index: {}]   ;;  %s1959_s5 = inlined_call_operand.hbm [shape: bf16[16,384], index: 5, kind: output, shape index: {}]  }
   0x1   :  { %1983 = sst [smem:[#allocation27_spill]] %s1954_s0 }
   0x2   :  { %1984 = sst [smem:[#allocation28_spill]] %s1955_s1 }
   0x3   :  { %1985 = sst [smem:[#allocation29_spill]] %s1956_s2 }
   0x4   :  { %1986 = sst [smem:[#allocation30_spill]] %s1957_s3 }
   0x5   :  { %1987 = sst [smem:[#allocation31_spill]] %s1959_s5 }
   0x6   :  { %10 = vsyncpa [#allocation4], 0 }
   0x7   :  { %12 = vsyncpa [#allocation4 + $0x1], 0 }
   0x8   :  { %13 = vsyncpa [#allocation7], 0 }
   0x9   :  { %15 = vsyncpa [#allocation7 + $0x1], 0 }
   0xa   :  { %16 = vsyncpa [#allocation10], 0 }
   0xb   :  { %18 = vsyncpa [#allocation10 + $0x1], 0 }
   0xc   :  { %19 = vsyncpa [#allocation5], 0 }
   0xd   :  { %21 = vsyncpa [#allocation5 + $0x1], 0  ;;  %s1489_s18 = smov 0   ;;  %s1491_s19 = smov 0  }
   0xe   :  { %s1493_s20 = smov 0   ;;  %s1495_s21 = smov 0  }
   0xf   :  { %s1497_s22 = smov 0   ;;  %s1499_s23 = smov 0  }
  0x10   :  { %s1501_s24 = smov 0   ;;  %s1503_s25 = smov 0  }
  0x11   :  { %s1505_s26 = smov 0   ;;  %s1507_s27 = smov 0  }
  0x12   :  { %s1509_s28 = smov 0   ;;  %s1511_s29 = smov 0  }
  0x13   :  { %s1513_s30 = smov 0   ;;  %s1515_s6 = smov 0  }
  0x14 LB: > { %1988 = sst [smem:[#allocation17_spill]] %s1393_s18  ;;  %s1558_s7 = sadd.s32 4294967295, %s1445_s6   ;;  %s1445_s6 = sphi %s1515_s6, %s27_s6   ;;  %s1441_s30 = sphi %s1513_s30, %s2039_s30   ;;  %s1437_s29 = sphi %s1511_s29, %s2050_s29   ;;  %s1433_s28 = sphi %s1509_s28, %s2037_s28   ;;  %s1429_s27 = sphi %s1507_s27, %s2049_s27   ;;  %s1425_s26 = sphi %s1505_s26, %s2048_s26   ;;  %s1421_s25 = sphi %s1503_s25, %s2047_s25   ;;  %s1417_s24 = sphi %s1501_s24, %s2046_s24   ;;  %s1413_s23 = sphi %s1499_s23, %s2045_s23   ;;  %s1409_s22 = sphi %s1497_s22, %s2044_s22   ;;  %s1405_s21 = sphi %s1495_s21, %s2043_s21   ;;  %s1401_s20 = sphi %s1493_s20, %s2042_s20   ;;  %s1397_s19 = sphi %s1491_s19, %s2041_s19   ;;  %s1393_s18 = sphi %s1489_s18, %s2040_s18  }
  0x15   : > { %1989 = sst [smem:[#allocation18_spill]] %s1397_s19  ;;  %s855_s8 = sadd.s32 4294967294, %s1445_s6  }
  0x16   : > { %1990 = sst [smem:[#allocation19_spill]] %s1429_s27  ;;  %p1963_p0 = scmp.eq.s32.totalorder %s1558_s7, 0 }
  0x17   : > { %1991 = sst [smem:[#allocation20_spill]] %s1433_s28  ;;  %p85_p1 = scmp.ne.s32.totalorder %s1409_s22, %s1405_s21 }
  0x18   : > { %1992 = sst [smem:[#allocation21_spill]] %s1441_s30  ;;  %p183_p2 = scmp.ne.s32.totalorder %s1401_s20, %s1397_s19 }
  0x19   : > { %p184_p3 = scmp.eq.s32.totalorder %s1558_s7, 5  ;;  %p1568_p4 = por %p85_p1, %p1963_p0 }
  0x1a   : > { %p189_p5 = scmp.ne.s32.totalorder %s1397_s19, %s1393_s18  ;;  %p190_p7 = scmp.eq.s32.totalorder %s855_s8, 5 }
  0x1b   : > { %s1993_s9 = scalar_select %p1568_p4, 1, 0 }
  0x1c   : > { %p1574_p6 = por %p184_p3, %p183_p2  ;;  %p856_p8 = scmp.ge.s32.totalorder %s1445_s6, 1 }
  0x1d   : > { %1994 = sst [smem:[#allocation22_spill]] %s1993_s9  ;;  %p197_p9 = scmp.lt.s32.totalorder %s1445_s6, 7 }
  0x1e   : > { %s1995_s10 = scalar_select %p1574_p6, 1, 0 }
  0x1f   : > { %p1580_p10 = por %p190_p7, %p189_p5  ;;  %p1584_p11 = pnand %p856_p8, %p197_p9 }
  0x20   : > { %1996 = sst [smem:[#allocation23_spill]] %s1995_s10  ;;  %s1447_s13 = smov [#allocation8]  }
  0x21   : > { %s1997_s11 = scalar_select %p1580_p10, 1, 0 }
  0x22   : > { %s1999_s12 = scalar_select %p1584_p11, 1, 0 }
  0x23   : > { %1998 = sst [smem:[#allocation24_spill]] %s1997_s11  ;;  %s209_s14 = sshll.u32 %s1447_s13, 4  ;;  %s210_s14 = int_to_ptr.vmem [resolvable:$true] %s209_s14 }
  0x24   : > { %p1003_p12 = pneg %p1584_p11  ;;  %s2001_s3 = sld [smem:[#allocation30_spill]] }
  0x26   : > { %p1592_p13 = pnand %p1003_p12, %p1963_p0 }
  0x28   : > { %p1171_p2 = pneg %p1592_p13 }
  0x2a   : > { %s1169_s21 = scalar_lea.hbm %s2001_s3, 1024 }
  0x2b   : > { %p1170_p1 = scmp.ne.s32.totalorder %s2001_s3, %s1169_s21  ;;  %p1176_p7 = scmp.lt.u32.totalorder %s1169_s21, %s2001_s3 }
  0x2d   : > { %p1172_p3 = pnand %p1171_p2, %p1170_p1 }
  0x2f   : > { %p1173_p5 = pneg %p1172_p3 }
  0x31   : > { %p1178_p8 = pnand %p1176_p7, %p1173_p5 }
  0x33   : > { %1181 = shalt.err (!%p1178_p8)
}
  0x34   : > { %s1182_s5 = scalar_lea.vmem %s210_s14, 1024  ;;  %p1190_p10 = scmp.lt.s32.totalorder %s210_s14, %s210_s14 }
  0x35   : > { %p1183_p9 = scmp.ne.s32.totalorder %s210_s14, %s1182_s5  ;;  %p1191_p6 = scmp.lt.s32.totalorder %s1182_s5, %s1182_s5 }
  0x37   : > { %p1185_p12 = pnand %p1183_p9, %p1171_p2  ;;  %p1192_p4 = por %p1191_p6, %p1190_p10 }
  0x39   : > { %p1186_p0 = pneg %p1185_p12 }
  0x3b   : > { %p1193_p11 = pnand %p1192_p4, %p1186_p0 }
  0x3d   : > { %1196 = shalt.err (!%p1193_p11)
}
  0x3e   : > { %s1967_s11 = smov 64   ;;  %s1969_s18 = smov 4  }
  0x3f   : > { %1006 = dma.hbm_to_vmem [thread:$0]  (!%p1592_p13), %s2001_s3, 1024, %s210_s14, [#allocation7], %s1967_s11, %s1967_s11, %s1969_s18  }
  0x40   : > { %s36_s17 = sadd.s32 1, %s1437_s29  ;;  %s39_s21 = sadd.s32 1, %s1441_s30 }
  0x41   : > { %p37_p0 = scmp.ge.s32.totalorder %s36_s17, 3  ;;  %s46_s8 = sadd.s32 1, %s1425_s26 }
  0x42   : > { %p53_p4 = scmp.ne.s32.totalorder %s1425_s26, %s1421_s25  ;;  %p54_p6 = scmp.eq.s32.totalorder %s1445_s6, 0 }
  0x43   : > { %s2052_s17 = smov (%p37_p0, %s36_s17), 0  ;;  %s2054_s21 = smov (!%p37_p0, %s39_s21), %s1441_s30 }
  0x44   : > { %2002 = sst [smem:[#allocation25_spill]] %s2052_s17  ;;  %p1626_p10 = por %p54_p6, %p53_p4 }
  0x45   : > { %p59_p11 = scmp.ne.s32.totalorder %s1421_s25, %s1417_s24  ;;  %p41_p13 = scmp.ge.s32.totalorder %s2054_s21, 2 }
  0x46   : > { %s69_s15 = ssub.s32 %s1437_s29, %s2052_s17  ;;  %p2004_p1 = scmp.eq.s32.totalorder %s1558_s7, 0 }
  0x47   : > { %p70_p3 = scmp.eq.s32.totalorder %s69_s15, 0  ;;  %s2056_s21 = smov (%p41_p13, %s2054_s21), 0 }
  0x48   : > { %p1636_p2 = por %p2004_p1, %p59_p11  ;;  %2006 = sst [smem:[#allocation26_spill]] %s2056_s21 }
  0x49   : > { %s72_s5 = sadd.s32 1, %s1413_s23  ;;  %p79_p5 = scmp.ne.s32.totalorder %s1413_s23, %s1409_s22 }
  0x4a   : > { %s2005_s13 = scalar_select %p1636_p2, 1, 0 }
  0x4b   : > { %s43_s16 = ssub.s32 %s1441_s30, %s2056_s21  ;;  %s173_s11 = sadd.s32 1, %s1401_s20 }
  0x4c   : > { %p44_p7 = scmp.eq.s32.totalorder %s43_s16, 0  ;;  %p1650_p8 = por %p79_p5, %p54_p6 }
  0x4d   : > { %s1655_s18 = scalar_select %p70_p3, %s1413_s23, %s72_s5  }
  0x4e   : > { %s1658_s3 = scalar_select %p44_p7, %s1425_s26, %s46_s8  }
  0x4f   : > { %s170_s17 = sor.u32 %s69_s15, %s43_s16  ;;  %p1022_p9 = scmp.lt.s32.totalorder %s1445_s6, 6 }
  0x50   : > { %p171_p12 = scmp.eq.s32.totalorder %s170_s17, 0  ;;  %s223_s10 = sand.u32 1, %s1425_s26  }
  0x51   : > { %s859_s28 = sshll.u32 %s223_s10, 2  ;;  %s860_s2 = sshll.u32 %s1441_s30, 6 }
  0x52   : > { %s1663_s21 = scalar_select %p171_p12, %s1401_s20, %s173_s11  }
  0x53   : > { %s2008_s0 = sld [smem:[#allocation27_spill]]  ;;  %s227_s5 = scalar_lea.vmem [#allocation3], %s859_s28 }
  0x54   : > { %s234_s8 = sshll.u32 %s227_s5, 4  ;;  %p1675_p0 = pnand %p1022_p9, %p1626_p10  ;;  %s1671_s8 = int_to_ptr.vmem [resolvable:$true] %s234_s8 }
  0x55   : > { %p1681_p4 = pnand %p1022_p9, %p1650_p8  ;;  %s224_s27 = scalar_lea.sflag [#allocation4], %s223_s10 }
  0x56   : > { %p1199_p11 = pneg %p1675_p0 }
  0x59   : > { %s1669_s9 = scalar_lea.hbm %s2008_s0, %s860_s2  ;;  %s241_s2 = sand.u32 1, %s1445_s6  }
  0x5a   : > { %s1197_s11 = scalar_lea.hbm %s1669_s9, 64  ;;  %s1202_s15 = scalar_lea.hbm %s2008_s0, 128 }
  0x5b   : > { %p1198_p6 = scmp.ne.s32.totalorder %s1669_s9, %s1197_s11  ;;  %p1203_p1 = scmp.lt.u32.totalorder %s1669_s9, %s2008_s0 }
  0x5c   : > { %p1204_p3 = scmp.lt.u32.totalorder %s1202_s15, %s1197_s11  ;;  %p1206_p7 = scmp.lt.u32.totalorder %s1197_s11, %s1669_s9 }
  0x5d   : > { %p1200_p13 = pnand %p1199_p11, %p1198_p6 }
  0x5e   : > { %p1205_p5 = por %p1204_p3, %p1203_p1 }
  0x5f   : > { %p1201_p10 = pneg %p1200_p13 }
  0x60   : > { %p1207_p8 = por %p1206_p7, %p1205_p5 }
  0x62   : > { %p1208_p9 = pnand %p1207_p8, %p1201_p10 }
  0x64   : > { %1211 = shalt.err (!%p1208_p9)
}
  0x65   : > { %s1212_s10 = scalar_lea.vmem %s1671_s8, 64  ;;  %s1450_s5 = smov [#allocation3]  }
  0x66   : > { %p1213_p12 = scmp.ne.s32.totalorder %s1671_s8, %s1212_s10  ;;  %s1217_s28 = sshll.u32 %s1450_s5, 4  ;;  %s1218_s28 = int_to_ptr.vmem [resolvable:$false] %s1217_s28 }
  0x67   : > { %s1219_s14 = scalar_lea.vmem %s1218_s28, 128  ;;  %p1220_p2 = scmp.lt.s32.totalorder %s1671_s8, %s1218_s28 }
  0x68   : > { %p1215_p6 = pnand %p1213_p12, %p1199_p11  ;;  %p1221_p1 = scmp.lt.s32.totalorder %s1219_s14, %s1212_s10 }
  0x6a   : > { %p1216_p13 = pneg %p1215_p6  ;;  %p1222_p3 = por %p1221_p1, %p1220_p2 }
  0x6c   : > { %p1223_p5 = pnand %p1222_p3, %p1216_p13 }
  0x6e   : > { %1226 = shalt.err (!%p1223_p5)
}
  0x6f   : > { %1010 = dma.hbm_to_vmem [thread:$0]  (!%p1675_p0), %s1669_s9, 64, %s1671_s8, %s224_s27  }
  0x70   : > { %s1981_s11 = sand.u32 1, %s1413_s23   ;;  %s862_s16 = sshll.u32 %s1437_s29, 6 }
  0x71   : > { %s1714_s15 = sshll.u32 %s1981_s11, 6  ;;  %s2011_s1 = sld [smem:[#allocation28_spill]] }
  0x72   : > { %s245_s5 = scalar_lea.vmem [#allocation6], %s1714_s15  ;;  %s1729_s9 = scalar_lea.sflag [#allocation7], %s241_s2 }
  0x73   : > { %s251_s28 = sshll.u32 %s245_s5, 4  ;;  %p1229_p0 = pneg %p1681_p4  ;;  %s1725_s28 = int_to_ptr.vmem [resolvable:$true] %s251_s28 }
  0x77   : > { %s1722_s17 = scalar_lea.hbm %s2011_s1, %s862_s16  ;;  %s1232_s24 = scalar_lea.hbm %s2011_s1, 3072 }
  0x78   : > { %s1227_s8 = scalar_lea.hbm %s1722_s17, 1024  ;;  %p1233_p7 = scmp.lt.u32.totalorder %s1722_s17, %s2011_s1 }
  0x79   : > { %p1228_p2 = scmp.ne.s32.totalorder %s1722_s17, %s1227_s8  ;;  %p1234_p8 = scmp.lt.u32.totalorder %s1232_s24, %s1227_s8 }
  0x7a   : > { %p1236_p12 = scmp.lt.u32.totalorder %s1227_s8, %s1722_s17 }
  0x7b   : > { %p1230_p11 = pnand %p1229_p0, %p1228_p2  ;;  %p1235_p9 = por %p1234_p8, %p1233_p7 }
  0x7d   : > { %p1231_p10 = pneg %p1230_p11  ;;  %p1237_p6 = por %p1236_p12, %p1235_p9 }
  0x7f   : > { %p1238_p13 = pnand %p1237_p6, %p1231_p10 }
  0x81   : > { %1241 = shalt.err (!%p1238_p13)
}
  0x82   : > { %s1242_s2 = scalar_lea.vmem %s1725_s28, 1024  ;;  %s1451_s5 = smov [#allocation6]  }
  0x83   : > { %p1243_p1 = scmp.ne.s32.totalorder %s1725_s28, %s1242_s2  ;;  %s1247_s27 = sshll.u32 %s1451_s5, 4  ;;  %s1248_s27 = int_to_ptr.vmem [resolvable:$false] %s1247_s27 }
  0x84   : > { %s1249_s11 = scalar_lea.vmem %s1248_s27, 2048  ;;  %p1250_p2 = scmp.lt.s32.totalorder %s1725_s28, %s1248_s27 }
  0x85   : > { %p1245_p3 = pnand %p1243_p1, %p1229_p0  ;;  %p1251_p11 = scmp.lt.s32.totalorder %s1249_s11, %s1242_s2 }
  0x87   : > { %p1246_p5 = pneg %p1245_p3  ;;  %p1252_p7 = por %p1251_p11, %p1250_p2 }
  0x89   : > { %p1253_p8 = pnand %p1252_p7, %p1246_p5 }
  0x8b   : > { %1256 = shalt.err (!%p1253_p8)
}
  0x8c   : > { %s1452_s8 = smov 192   ;;  %s2012_s14 = smov 4  }
  0x8d   : > { %s2013_s24 = smov 64   ;;  %s1765_s5 = scalar_lea.hbm %s1958_s4, %s862_s16 }
  0x8e   : > { %1013 = dma.hbm_to_vmem [thread:$0]  (!%p1681_p4), %s1722_s17, 1024, %s1725_s28, %s1729_s9, %s1452_s8, %s2013_s24, %s2012_s14  }
  0x8f   : > { %s271_s27 = scalar_lea.vmem [#allocation9], %s1714_s15  ;;  %s2014_s0 = sand.u32 1, %s1413_s23  }
  0x90   : > { %s277_s11 = sshll.u32 %s271_s27, 4  ;;  %s1772_s1 = scalar_lea.sflag [#allocation10], %s2014_s0  ;;  %s1768_s11 = int_to_ptr.vmem [resolvable:$true] %s277_s11 }
  0x91   : > { %s1257_s30 = scalar_lea.hbm %s1765_s5, 1024  ;;  %s1262_s28 = scalar_lea.hbm %s1958_s4, 3072 }
  0x92   : > { %p1258_p10 = scmp.ne.s32.totalorder %s1765_s5, %s1257_s30  ;;  %p1263_p6 = scmp.lt.u32.totalorder %s1765_s5, %s1958_s4 }
  0x93   : > { %p1264_p13 = scmp.lt.u32.totalorder %s1262_s28, %s1257_s30  ;;  %p1266_p3 = scmp.lt.u32.totalorder %s1257_s30, %s1765_s5 }
  0x94   : > { %p1260_p9 = pnand %p1258_p10, %p1229_p0 }
  0x95   : > { %p1265_p1 = por %p1264_p13, %p1263_p6 }
  0x96   : > { %p1261_p12 = pneg %p1260_p9 }
  0x97   : > { %p1267_p5 = por %p1266_p3, %p1265_p1 }
  0x99   : > { %p1268_p2 = pnand %p1267_p5, %p1261_p12 }
  0x9b   : > { %1271 = shalt.err (!%p1268_p2)
}
  0x9c   : > { %s1272_s0 = scalar_lea.vmem %s1768_s11, 1024  ;;  %s1453_s15 = smov [#allocation9]  }
  0x9d   : > { %p1273_p11 = scmp.ne.s32.totalorder %s1768_s11, %s1272_s0  ;;  %s1277_s2 = sshll.u32 %s1453_s15, 4  ;;  %s1278_s2 = int_to_ptr.vmem [resolvable:$false] %s1277_s2 }
  0x9e   : > { %s1279_s27 = scalar_lea.vmem %s1278_s2, 2048  ;;  %p1280_p10 = scmp.lt.s32.totalorder %s1768_s11, %s1278_s2 }
  0x9f   : > { %p1275_p7 = pnand %p1273_p11, %p1229_p0  ;;  %p1281_p9 = scmp.lt.s32.totalorder %s1279_s27, %s1272_s0 }
  0xa1   : > { %p1276_p8 = pneg %p1275_p7  ;;  %p1282_p6 = por %p1281_p9, %p1280_p10 }
  0xa3   : > { %p1283_p13 = pnand %p1282_p6, %p1276_p8 }
  0xa5   : > { %1286 = shalt.err (!%p1283_p13)
}
  0xa6   : > { %1016 = dma.hbm_to_vmem [thread:$0]  (!%p1681_p4), %s1765_s5, 1024, %s1768_s11, %s1772_s1, %s1452_s8, %s2013_s24, %s2012_s14  }
  0xa7   : > { %p2015_p0 = scmp.ne.s32.totalorder %s1999_s12, 0 }
  0xa8   : > { %s291_s30 = sand.u32 (!%p2015_p0), 1, %s1421_s25   ;;  %p2016_p12 = scmp.ne.s32.totalorder (!%p2015_p0), %s2005_s13, 0 }
  0xa9   : > { %289 = sbr.rel (%p2015_p0) target bundleno = 714 (0x2ca), region = 40  ;;  %s866_s17 = sshll.u32 (!%p2015_p0), %s291_s30, 2 }
  0xaa   : > { %s292_s16 = scalar_lea.sflag (!%p2015_p0), [#allocation4], %s291_s30  ;;  %s295_s28 = scalar_lea.vmem (!%p2015_p0), [#allocation3], %s866_s17 }
  0xb0   : > { %1372 = dma.done.wait (%p2016_p12), %s292_s16, 64  }
  0xb1   : > { %1374 = vsyncadd (%p2016_p12), %s292_s16, 4294967232  ;;  %s2017_s19 = sld [smem:[#allocation22_spill]]  ;;  %s300_s9 = sand.u32 1, %s1558_s7  }
  0xb2   : > { %s302_s10 = sand.u32 1, %s1409_s22   ;;  %s301_s8 = scalar_lea.sflag [#allocation7], %s300_s9 }
  0xb3   : > { %s867_s1 = sshll.u32 %s302_s10, 6 }
  0xb4   : > { %s1810_s12 = scalar_lea.vmem [#allocation6], %s867_s1 }
  0xb7   : > { %p2018_p4 = scmp.ne.s32.totalorder %s2017_s19, 0 }
  0xb9   : > { %1376 = dma.done.wait (%p2018_p4), %s301_s8, 1024  }
  0xba   : > { %1378 = vsyncadd (%p2018_p4), %s301_s8, 4294966272  ;;  %p2019_p1 = scmp.eq.s32.totalorder %s1558_s7, 0 }
  0xbc   : > { %1380 = dma.done.wait (%p2019_p1), [#allocation7], 1024   ;;  %p2020_p3 = pmov %p2019_p1 }
  0xbd   : > { %s314_s13 = scalar_lea.sflag [#allocation10], %s302_s10  ;;  %s1820_s14 = scalar_lea.vmem [#allocation9], %s867_s1 }
  0xbe   : > { %1382 = vsyncadd (%p2020_p3), [#allocation7], 4294966272 }
  0xbf   : > { %1384 = dma.done.wait (%p2018_p4), %s314_s13, 1024  }
  0xc0   : > { %1386 = vsyncadd (%p2018_p4), %s314_s13, 4294966272  ;;  %s2021_s24 = sld [smem:[#allocation18_spill]]  ;;  %s2022_s5 = sld [smem:[#allocation19_spill]]  ;;  %v1839_v0 = vld [vmem:[%s295_s28] sm:$0xf] }
  0xc1   : > { %s2023_s27 = sld [smem:[#allocation29_spill]] }
  0xc6   : > { %s354_s11 = sand.u32 1, %s2021_s24   ;;  %p357_p5 = scmp.lt.s32.totalorder %s2022_s5, 2 }
  0xc7   : > { %s1830_s0 = sshll.u32 %s354_s11, 2  ;;  %p871_p2 = scmp.ne.s32.totalorder %s2022_s5, 0 }
  0xc8   : > { %s1833_s7 = scalar_select %p357_p5, %s2022_s5, 2 }
  0xc9   : > { %s356_s17 = scalar_lea.vmem [#allocation11], %s1830_s0  ;;  %365 = sbr.rel (%p871_p2) target bundleno = 449 (0x1c1), region = 60  ;;  %v1145_v1 = vld [vmem:[#allocation8] sm:$0xff] (!%p871_p2)   ;;  %v1454_v2 = vmov (!%p871_p2), 0.0   ;;  %v1146_v3 = vld [vmem:[#allocation8 + $0x8] sm:$0xff] (!%p871_p2)   ;;  %vm1455_vm0 = vmmov (!%p871_p2), 0  }
  0xca   : > { %s359_s30 = scalar_lea.vmem %s2023_s27, %s1833_s7  ;;  %928 = vmatprep.subr.bf16.mxu0 (!%p871_p2), %v1454_v2  ;;  %944 = vmatprep.mubr.msk.bf16.mxu0 (!%p871_p2), %vm1455_vm0, %v1454_v2  ;;  %v1147_v4 = vld [vmem:[#allocation8 + $0x10] sm:$0xff] (!%p871_p2)   ;;  %v1148_v5 = vld [vmem:[#allocation8 + $0x18] sm:$0xff] (!%p871_p2)   ;;  %v1149_v6 = vld [vmem:[#allocation8 + $0x20] sm:$0xff] (!%p871_p2)  }
  0xcb   : > { %929 = vmatpush3.bf16.msra.mxu0 (!%p871_p2), %v1145_v1  ;;  %v1150_v7 = vld [vmem:[#allocation8 + $0x28] sm:$0xff] (!%p871_p2)   ;;  %v1151_v8 = vld [vmem:[#allocation8 + $0x30] sm:$0xff] (!%p871_p2)   ;;  %v1152_v9 = vld [vmem:[#allocation8 + $0x38] sm:$0xff] (!%p871_p2)  }
  0xcc   : > { %930 = vmatprep.subr.bf16.mxu0 (!%p871_p2), %v1454_v2 }
  0xcf   : > { %931 = vmatpush3.bf16.msra.mxu0 (!%p871_p2), %v1146_v3 }
  0xd0   : > { %932 = vmatprep.subr.bf16.mxu0 %v1454_v2 }
  0xd3   : > { %933 = vmatpush3.bf16.msra.mxu0 %v1147_v4 }
  0xd4   : > { %934 = vmatprep.subr.bf16.mxu0 %v1454_v2 }
  0xd7   : > { %935 = vmatpush3.bf16.msra.mxu0 %v1148_v5 }
  0xd8   : > { %936 = vmatprep.subr.bf16.mxu0 %v1454_v2 }
  0xdb   : > { %937 = vmatpush3.bf16.msra.mxu0 %v1149_v6 }
  0xdc   : > { %938 = vmatprep.subr.bf16.mxu0 %v1454_v2 }
  0xdf   : > { %939 = vmatpush3.bf16.msra.mxu0 %v1150_v7 }
  0xe0   : > { %940 = vmatprep.subr.bf16.mxu0 %v1454_v2 }
  0xe3   : > { %941 = vmatpush3.bf16.msra.mxu0 %v1151_v8 }
  0xe4   : > { %942 = vmatprep.subr.bf16.mxu0 %v1454_v2 }
  0xe7   : > { %943 = vmatpush3.bf16.msra.mxu0 %v1152_v9 }
  0xea   : > { %945 = vmatmul.mubr.bf16.vlgmr.msra.gmra.mrb[0].mxu0 %v1839_v0 }
 0x1bd   : > { %v464_v10 = vpop.f32.mrb[0].mxu0 }
 0x1be   : > { %v470_v11 = vpack.c.bf16 %v464_v10, %v464_v10  ;;  %v946_v12 = vpop.f32.mrb[1].mxu0 }
 0x1bf   : > { %v467_v13 = vpop.f32.mrb[2].mxu0 }
 0x1c0   : > { %471 = vst [vmem:[#allocation2] sm:$0xf] %v470_v11  ;;  %v947_v14 = vpop.f32.mrb[3].mxu0 }
 0x1c1 PF: > { %v1153_v15 = vld [vmem:[%s1810_s12] sm:$0xff]   ;;  %v1456_v16 = vmov 0.0   ;;  %v1155_v18 = vld [vmem:[%s1810_s12 + $0x8] sm:$0xff]   ;;  %vm1457_vm1 = vmmov 0   ;;  %v1157_v20 = vld [vmem:[%s1810_s12 + $0x10] sm:$0xff]   ;;  %s2024_s16 = sld [smem:[#allocation20_spill]] }
 0x1c2   : > { %948 = vmatprep.subr.bf16.mxu1 %v1456_v16  ;;  %968 = vmatprep.subr.bf16.mxu0 %v1456_v16  ;;  %v1154_v17 = vld [vmem:[%s1820_s14] sm:$0xff]   ;;  %v1156_v19 = vld [vmem:[%s1820_s14 + $0x8] sm:$0xff]   ;;  %v1158_v21 = vld [vmem:[%s1820_s14 + $0x10] sm:$0xff]   ;;  %s2025_s28 = sld [smem:[#allocation19_spill]]  ;;  %s2028_s13 = sld [smem:[#allocation23_spill]] }
 0x1c3   : > { %949 = vmatpush3.bf16.msra.mxu1 %v1153_v15  ;;  %964 = vmatprep.mubr.msk.bf16.mxu1 %vm1457_vm1, %v1456_v16  ;;  %v1159_v22 = vld [vmem:[%s1810_s12 + $0x18] sm:$0xff]   ;;  %v1161_v24 = vld [vmem:[%s1810_s12 + $0x20] sm:$0xff]   ;;  %v1163_v26 = vld [vmem:[%s1810_s12 + $0x28] sm:$0xff]   ;;  %s707_s24 = sshll.u32 %s356_s17, 4  ;;  %s2029_s15 = sld [smem:[#allocation31_spill]]  ;;  %s1875_s24 = int_to_ptr.vmem [resolvable:$true] %s707_s24 }
 0x1c4   : > { %969 = vmatpush3.bf16.msra.mxu0 %v1154_v17  ;;  %950 = vmatprep.subr.bf16.mxu1 %v1456_v16  ;;  %v1160_v23 = vld [vmem:[%s1820_s14 + $0x18] sm:$0xff]   ;;  %v1162_v25 = vld [vmem:[%s1820_s14 + $0x20] sm:$0xff]   ;;  %v1164_v27 = vld [vmem:[%s1820_s14 + $0x28] sm:$0xff]   ;;  %s692_s27 = scalar_lea.sflag [#allocation5], %s354_s11 }
 0x1c5   : > { %970 = vmatprep.subr.bf16.mxu0 %v1456_v16  ;;  %984 = vmatprep.mubr.msk.bf16.mxu0 %vm1457_vm1, %v1456_v16  ;;  %v1165_v28 = vld [vmem:[%s1810_s12 + $0x30] sm:$0xff]   ;;  %v1167_v30 = vld [vmem:[%s1810_s12 + $0x38] sm:$0xff]  }
 0x1c6   : > { %v1166_v29 = vld [vmem:[%s1820_s14 + $0x30] sm:$0xff]   ;;  %v1168_v31 = vld [vmem:[%s1820_s14 + $0x38] sm:$0xff]  }
 0x1c7   : > { %951 = vmatpush3.bf16.msra.mxu1 %v1155_v18  ;;  %v583_v32 = vld [vmem:[#allocation2] sm:$0xf]  ;;  %s990_s19 = smul.u32 3, %s2024_s16  ;;  %s1458_s16 = smov [#allocation11]  }
 0x1c8   : > { %971 = vmatpush3.bf16.msra.mxu0 %v1156_v19  ;;  %952 = vmatprep.subr.bf16.mxu1 %v1456_v16  ;;  %v880_v33 = vld [vmem:[%s359_s30] ss:$0 sm:$0xff]  ;;  %s1287_s30 = scalar_lea.vmem %s1875_s24, 64  ;;  %p2030_p7 = scmp.ne.s32.totalorder %s2028_s13, 0 }
 0x1c9   : > { %972 = vmatprep.subr.bf16.mxu0 %v1456_v16  ;;  %s703_s8 = sadd.s32 %s2025_s28, %s990_s19  ;;  %p1288_p11 = scmp.ne.s32.totalorder %s1875_s24, %s1287_s30 }
 0x1ca   : > { %s898_s14 = sshll.u32 %s703_s8, 6  ;;  %s1291_s28 = sshll.u32 %s1458_s16, 4  ;;  %s1292_s28 = int_to_ptr.vmem [resolvable:$false] %s1291_s28 }
 0x1cb   : > { %953 = vmatpush3.bf16.msra.mxu1 %v1157_v20  ;;  %s1873_s2 = scalar_lea.hbm %s2029_s15, %s898_s14  ;;  %p1289_p8 = pnand %p1288_p11, %p2030_p7 }
 0x1cc   : > { %973 = vmatpush3.bf16.msra.mxu0 %v1158_v21  ;;  %954 = vmatprep.subr.bf16.mxu1 %v1456_v16  ;;  %s1293_s19 = scalar_lea.vmem %s1292_s28, 128  ;;  %p1294_p9 = scmp.lt.s32.totalorder %s1875_s24, %s1292_s28 }
 0x1cd   : > { %974 = vmatprep.subr.bf16.mxu0 %v1456_v16  ;;  %p1290_p10 = pneg %p1289_p8  ;;  %p1295_p6 = scmp.lt.s32.totalorder %s1293_s19, %s1287_s30 }
 0x1cf   : > { %955 = vmatpush3.bf16.msra.mxu1 %v1159_v22  ;;  %p1296_p13 = por %p1295_p6, %p1294_p9 }
 0x1d0   : > { %975 = vmatpush3.bf16.msra.mxu0 %v1160_v23  ;;  %956 = vmatprep.subr.bf16.mxu1 %v1456_v16 }
 0x1d1   : > { %976 = vmatprep.subr.bf16.mxu0 %v1456_v16  ;;  %p1297_p0 = pnand %p1296_p13, %p1290_p10 }
 0x1d3   : > { %957 = vmatpush3.bf16.msra.mxu1 %v1161_v24 }
 0x1d4   : > { %977 = vmatpush3.bf16.msra.mxu0 %v1162_v25  ;;  %958 = vmatprep.subr.bf16.mxu1 %v1456_v16 }
 0x1d5   : > { %978 = vmatprep.subr.bf16.mxu0 %v1456_v16 }
 0x1d7   : > { %959 = vmatpush3.bf16.msra.mxu1 %v1163_v26 }
 0x1d8   : > { %979 = vmatpush3.bf16.msra.mxu0 %v1164_v27  ;;  %960 = vmatprep.subr.bf16.mxu1 %v1456_v16 }
 0x1d9   : > { %980 = vmatprep.subr.bf16.mxu0 %v1456_v16 }
 0x1db   : > { %961 = vmatpush3.bf16.msra.mxu1 %v1165_v28 }
 0x1dc   : > { %981 = vmatpush3.bf16.msra.mxu0 %v1166_v29  ;;  %962 = vmatprep.subr.bf16.mxu1 %v1456_v16 }
 0x1dd   : > { %982 = vmatprep.subr.bf16.mxu0 %v1456_v16 }
 0x1df   : > { %963 = vmatpush3.bf16.msra.mxu1 %v1167_v30 }
 0x1e0   : > { %983 = vmatpush3.bf16.msra.mxu0 %v1168_v31 }
 0x1e2   : > { %965 = vmatmul.mubr.bf16.vlgmr.msra.gmra.mrb[0].mxu1 %v1839_v0 }
 0x1e3   : > { %985 = vmatmul.mubr.bf16.vlgmr.msra.gmra.mrb[0].mxu0 %v583_v32 }
 0x2b5   : > { %v577_v34 = vpop.f32.mrb[0].mxu1 }
 0x2b6   : > { %v578_v35 = vadd.f32 %v880_v33, %v577_v34  ;;  %v682_v36 = vpop.f32.mrb[0].mxu0  ;;  %v966_v37 = vpop.f32.mrb[1].mxu1 }
 0x2b7   : > { %v986_v38 = vpop.f32.mrb[1].mxu0  ;;  %v580_v39 = vpop.f32.mrb[2].mxu1 }
 0x2b8   : > { %v688_v40 = vadd.f32 %v682_v36, %v578_v35  ;;  %v685_v41 = vpop.f32.mrb[2].mxu0  ;;  %v967_v42 = vpop.f32.mrb[3].mxu1 }
 0x2b9   : > { %v987_v43 = vpop.f32.mrb[3].mxu0 }
 0x2ba   : > { %v689_v44 = vpack.c.bf16 %v688_v40, %v688_v40 }
 0x2bc   : > { %690 = vst [vmem:[%s356_s17] sm:$0xf] %v689_v44 }
 0x2bd   : > { %1300 = shalt.err (!%p1297_p0)
}
 0x2be   : > { %s1301_s11 = scalar_lea.hbm %s1873_s2, 64  ;;  %s1305_s9 = scalar_lea.hbm %s2029_s15, 384 }
 0x2bf   : > { %p1302_p12 = scmp.ne.s32.totalorder %s1873_s2, %s1301_s11  ;;  %p1306_p3 = scmp.lt.u32.totalorder %s1873_s2, %s2029_s15 }
 0x2c0   : > { %p1307_p5 = scmp.lt.u32.totalorder %s1305_s9, %s1301_s11  ;;  %p1309_p11 = scmp.lt.u32.totalorder %s1301_s11, %s1873_s2 }
 0x2c1   : > { %p1303_p4 = pnand %p1302_p12, %p2030_p7 }
 0x2c2   : > { %p1308_p2 = por %p1307_p5, %p1306_p3 }
 0x2c3   : > { %p1304_p1 = pneg %p1303_p4 }
 0x2c4   : > { %p1310_p8 = por %p1309_p11, %p1308_p2 }
 0x2c6   : > { %p1311_p10 = pnand %p1310_p8, %p1304_p1 }
 0x2c8   : > { %1314 = shalt.err (!%p1311_p10)
}
 0x2c9   : > { %1001 = dma.vmem_to_hbm [thread:$0]  (%p2030_p7), %s1875_s24, 64, %s1873_s2, %s692_s27  }
 0x2ca PF: > { %s2031_s8 = sld [smem:[#allocation17_spill]]  ;;  %s2032_s12 = sld [smem:[#allocation24_spill]] }
 0x2cb   : > { %p1024_p9 = scmp.ge.s32.totalorder %s1445_s6, 2 }
 0x2d0   : > { %s719_s14 = sand.u32 1, %s2031_s8   ;;  %p2033_p6 = scmp.ne.s32.totalorder %s2032_s12, 0 }
 0x2d1   : > { %s720_s5 = scalar_lea.sflag [#allocation5], %s719_s14 }
 0x2d2   : > { %p1018_p13 = pnand %p1024_p9, %p2033_p6 }
 0x2d4   : > { %1388 = dma.done.wait (!%p1018_p13), %s720_s5, 64  }
 0x2d5   : > { %1390 = vsyncadd (!%p1018_p13), %s720_s5, 4294967232  ;;  %s27_s6 = sadd.s32 1, %s1445_s6   ;;  %s2035_s13 = sld [smem:[#allocation18_spill]] }
 0x2d6   : > { %p1907_p0 = scmp.ge.s32.totalorder %s27_s6, 8   ;;  %s2036_s24 = smov %s1655_s18 }
 0x2d7   : > { %s2037_s28 = sld [smem:[#allocation21_spill]]  ;;  %s2038_s2 = sld [smem:[#allocation25_spill]] }
 0x2d8   : > { %s2039_s30 = sld [smem:[#allocation26_spill]]  ;;  %s2041_s19 = smov %s1401_s20 }
 0x2d9   : > { %s2042_s20 = smov %s1663_s21  ;;  %s2043_s21 = smov %s1409_s22 }
 0x2da   : > { %s2044_s22 = smov %s1413_s23  ;;  %s2045_s23 = smov %s2036_s24 }
 0x2db   : > { %s2040_s18 = smov %s2035_s13  ;;  %s2046_s24 = smov %s1421_s25 }
 0x2dc   : > { %s2047_s25 = smov %s1425_s26  ;;  %s2048_s26 = smov %s1658_s3 }
 0x2dd   : > { %s2049_s27 = smov %s1437_s29  ;;  %s2050_s29 = smov %s2038_s2 }
 0x2de   :  { %26 = sbr.rel (!%p1907_p0) target bundleno = 20 (0x14), region = 122 }
 0x2e5   :  { %725 = vsyncpa [#allocation4], 1 }
 0x2e6   :  { %727 = vsyncpa [#allocation4 + $0x1], 1 }
 0x2e7   :  { %728 = vsyncpa [#allocation7], 1 }
 0x2e8   :  { %730 = vsyncpa [#allocation7 + $0x1], 1 }
 0x2e9   :  { %731 = vsyncpa [#allocation10], 1 }
 0x2ea   :  { %733 = vsyncpa [#allocation10 + $0x1], 1 }
 0x2eb   :  { %734 = vsyncpa [#allocation5], 1 }
 0x2ec   :  { %736 = vsyncpa [#allocation5 + $0x1], 1 }

</bundles_post_ra>
